<compile_context>
chip_gen: v7x
topology: tpu7x:2x2x1
jax: 0.10.0
libtpu: 0.0.40
codegen_flags: <defaults>
</compile_context>

<pallas_src>
import functools
import math

import jax
import jax.numpy as jnp
import numpy as np
from jax.experimental import pallas as pl
from jax.experimental.pallas import tpu as pltpu


def _round_up(x, m):
    return (x + m - 1) // m * m


# ----------------------------------------------------------------------------
# Kernel 1: base stand-in (patchify conv) + seg 1x1 conv, two chained matmuls
# over a tile of TM pixel-rows.  Weights stay VMEM-resident across the grid.
# ----------------------------------------------------------------------------
def seg_head_kernel(xp_ref, wb_ref, bb_ref, ws_ref, bs_ref, out_ref):
    # xp: [TM, K]  wb: [K, D]  bb: [1, D]  ws: [D, Cpad]  bs: [1, Cpad]  out: [TM, Cpad]
    # NOTE: if the real backbone's out_dim (e.g. 512) makes this compute-bound,
    # cast xp/wb (and feat/ws) to bfloat16 and keep f32 accumulation.
    feat = jnp.dot(xp_ref[...], wb_ref[...], preferred_element_type=jnp.float32)
    feat = jnp.maximum(feat + bb_ref[...], 0.0)  # stand-in nonlinearity for DRN base
    out_ref[...] = (
        jnp.dot(feat, ws_ref[...], preferred_element_type=jnp.float32) + bs_ref[...]
    )


# ----------------------------------------------------------------------------
# Kernel 2: depthwise bilinear transposed conv (kernel 16, stride 8, pad 4)
# as  out = Uy @ F @ Ux^T  over a block of P planes and a TWo-wide output slab.
# ----------------------------------------------------------------------------
def upsample_kernel(f2d_ref, uy_ref, uxt_ref, out_ref, g_ref):
    # f2d: [P*Hf, Wf]  uy: [Ho, Hf]  uxt: [Wf, TWo]  out: [P, Ho, TWo]  g: [P*Hf, TWo]
    P = out_ref.shape[0]
    Hf = uy_ref.shape[1]
    # Column pass: one large matmul, lane dim = TWo (unmasked stores).
    g_ref[...] = jnp.dot(
        f2d_ref[...], uxt_ref[...], preferred_element_type=jnp.float32
    )
    uy = uy_ref[...]
    # Row pass: P matmuls with the output width on the lane axis.
    for p in range(P):
        out_ref[p] = jnp.dot(
            uy, g_ref[p * Hf:(p + 1) * Hf, :], preferred_element_type=jnp.float32
        )


# ----------------------------------------------------------------------------
# Parameter / constant construction (deterministic, in-script)
# ----------------------------------------------------------------------------
def bilinear_1d(kernel=16):
    # Exactly fill_up_weights() but in 1D (the 2D kernel is separable).
    f = math.ceil(kernel / 2)
    c = (2 * f - 1 - f % 2) / (2.0 * f)
    return np.array([1.0 - abs(i / f - c) for i in range(kernel)], dtype=np.float32)


@functools.lru_cache(maxsize=None)
def build_up_matrix(in_size, kernel=16, stride=8, pad=4):
    # U[o, i] = w1d[o + pad - i*stride] (when in range), so that
    # ConvTranspose2d(out) = Uy @ feat @ Ux^T per channel.  Cached per size so
    # the O(Ho*Hf) host loop runs once per shape, not per trace.
    out_size = (in_size - 1) * stride - 2 * pad + kernel
    w1 = bilinear_1d(kernel)
    U = np.zeros((out_size, in_size), dtype=np.float32)
    for o in range(out_size):
        for i in range(in_size):
            k = o + pad - i * stride
            if 0 <= k < kernel:
                U[o, i] = w1[k]
    return U


def init_params(key, in_ch, out_dim, n_classes, patch=8):
    k1, k2 = jax.random.split(key)
    K = in_ch * patch * patch
    # Stand-in base ("patchify" conv, stride 8): He-style init, deterministic.
    w_base = jax.random.normal(k1, (K, out_dim), jnp.float32) * math.sqrt(2.0 / K)
    b_base = jnp.zeros((1, out_dim), jnp.float32)
    # seg 1x1 conv: weight ~ N(0, sqrt(2/n)), n = kh*kw*out_channels = n_classes.
    w_seg = jax.random.normal(k2, (out_dim, n_classes), jnp.float32) * math.sqrt(
        2.0 / n_classes
    )
    b_seg = jnp.zeros((1, n_classes), jnp.float32)
    return dict(w_base=w_base, b_base=b_base, w_seg=w_seg, b_seg=b_seg)


# ----------------------------------------------------------------------------
# Forward wrapper
# ----------------------------------------------------------------------------
def drnseg_forward(x, params, n_classes, patch=8):
    # x: [N, Cin, H, W]  (NCHW, float32)
    N, Cin, H, W = x.shape
    Hf, Wf = H // patch, W // patch
    M = N * Hf * Wf
    K = Cin * patch * patch
    out_dim = params["w_base"].shape[1]

    # --- glue: patchify NCHW -> [M, K] (channels-last patches) ---
    # TODO(synk): this is one XLA transpose pass over the input; it could be
    # folded into kernel 1 via an (N, Hf)-gridded index_map on NHWC input.
    xp = (
        x.reshape(N, Cin, Hf, patch, Wf, patch)
        .transpose(0, 2, 4, 1, 3, 5)
        .reshape(M, K)
    )

    # Tile M; pad the class axis to 128 lanes so stores are unmasked.
    TM = 512 if M >= 512 else _round_up(M, 8)
    M_pad = _round_up(M, TM)
    if M_pad > M:
        xp = jnp.pad(xp, ((0, M_pad - M), (0, 0)))
    Cpad = _round_up(n_classes, 128)
    w_seg_p = jnp.pad(params["w_seg"], ((0, 0), (0, Cpad - n_classes)))
    b_seg_p = jnp.pad(params["b_seg"], ((0, 0), (0, Cpad - n_classes)))

    # --- Pallas kernel 1: base stand-in + seg 1x1 conv, tiled over M ---
    seg_p = pl.pallas_call(
        seg_head_kernel,
        out_shape=jax.ShapeDtypeStruct((M_pad, Cpad), jnp.float32),
        grid=(M_pad // TM,),
        in_specs=[
            pl.BlockSpec((TM, K), lambda i: (i, 0)),
            pl.BlockSpec((K, out_dim), lambda i: (0, 0)),
            pl.BlockSpec((1, out_dim), lambda i: (0, 0)),
            pl.BlockSpec((out_dim, Cpad), lambda i: (0, 0)),
            pl.BlockSpec((1, Cpad), lambda i: (0, 0)),
        ],
        out_specs=pl.BlockSpec((TM, Cpad), lambda i: (i, 0)),
        compiler_params=pltpu.CompilerParams(dimension_semantics=("parallel",)),
    )(xp, params["w_base"], params["b_base"], w_seg_p, b_seg_p)

    # --- glue (low-res, cheap): [M, Cpad] -> [NC_pad*Hf, Wf] plane rows ---
    seg = seg_p[:M, :n_classes]
    NC = N * n_classes
    feat = (
        seg.reshape(N, Hf, Wf, n_classes)
        .transpose(0, 3, 1, 2)
        .reshape(NC, Hf, Wf)
    )
    P = 8 if NC >= 8 else NC
    NC_pad = _round_up(NC, P)
    if NC_pad > NC:
        feat = jnp.pad(feat, ((0, NC_pad - NC), (0, 0), (0, 0)))
    feat2d = feat.reshape(NC_pad * Hf, Wf)  # contiguous reshape, no transpose

    # --- Pallas kernel 2: depthwise bilinear ConvTranspose2d, batched planes ---
    Uy = jnp.asarray(build_up_matrix(Hf))            # [Ho, Hf]
    UxT = jnp.asarray(build_up_matrix(Wf).T)         # [Wf, Wo]
    Ho, Wo = Uy.shape[0], UxT.shape[1]
    if Wo % 256 == 0:
        TWo = 256
    elif Wo % 128 == 0:
        TWo = 128
    else:
        TWo = Wo

    up = pl.pallas_call(
        upsample_kernel,
        out_shape=jax.ShapeDtypeStruct((NC_pad, Ho, Wo), jnp.float32),
        grid=(NC_pad // P, Wo // TWo),
        in_specs=[
            pl.BlockSpec((P * Hf, Wf), lambda pb, wb: (pb, 0)),
            pl.BlockSpec((Ho, Hf), lambda pb, wb: (0, 0)),
            pl.BlockSpec((Wf, TWo), lambda pb, wb: (0, wb)),
        ],
        out_specs=pl.BlockSpec((P, Ho, TWo), lambda pb, wb: (pb, 0, wb)),
        scratch_shapes=[pltpu.VMEM((P * Hf, TWo), jnp.float32)],
        compiler_params=pltpu.CompilerParams(
            dimension_semantics=("parallel", "parallel")
        ),
    )(feat2d, Uy, UxT)

    # --- glue: back to NCHW (pure reshape, no transpose) ---
    return up[:NC].reshape(N, n_classes, Ho, Wo)


if __name__ == "__main__":
    key = jax.random.PRNGKey(0)
    kx, kp = jax.random.split(key)

    N, Cin, H, W = 2, 4, 16, 16
    out_dim, n_classes = 32, 4

    x = jax.random.normal(kx, (N, Cin, H, W), jnp.float32)
    params = init_params(kp, Cin, out_dim, n_classes)

    fwd = jax.jit(functools.partial(drnseg_forward, n_classes=n_classes))
    y = fwd(x, params)
    jax.block_until_ready(y)

    assert y.shape == (N, n_classes, H, W), y.shape
    print("KERNEL_OK")
</pallas_src>

<mosaic_0001>
module attributes {stable_mosaic.version = 11 : i64} {
  func.func @seg_head_kernel(%arg0: i32, %arg1: memref<8x256xf32, #tpu.memory_space<vmem>>, %arg2: memref<256x32xf32, #tpu.memory_space<vmem>>, %arg3: memref<1x32xf32, #tpu.memory_space<vmem>>, %arg4: memref<32x128xf32, #tpu.memory_space<vmem>>, %arg5: memref<1x128xf32, #tpu.memory_space<vmem>>, %arg6: memref<8x128xf32, #tpu.memory_space<vmem>>) attributes {dimension_semantics = [#tpu.dimension_semantics<parallel>], iteration_bounds = array<i64: 1>, scalar_prefetch = 0 : i64, scratch_operands = 0 : i64, tpu.core_type = #tpu.core_type<tc>, window_params = [{transform_indices = @transform_0, window_bounds = array<i64: 8, 256>}, {pipeline_mode = #tpu.pipeline_mode<synchronous>, transform_indices = @transform_1, window_bounds = array<i64: 256, 32>}, {pipeline_mode = #tpu.pipeline_mode<synchronous>, transform_indices = @transform_2, window_bounds = array<i64: 1, 32>}, {pipeline_mode = #tpu.pipeline_mode<synchronous>, transform_indices = @transform_3, window_bounds = array<i64: 32, 128>}, {pipeline_mode = #tpu.pipeline_mode<synchronous>, transform_indices = @transform_4, window_bounds = array<i64: 1, 128>}, {transform_indices = @transform_5, window_bounds = array<i64: 8, 128>}]} {
    %c0 = arith.constant 0 : index
    %c0_0 = arith.constant 0 : index
    %0 = vector.load %arg1[%c0, %c0_0] : memref<8x256xf32, #tpu.memory_space<vmem>>, vector<8x256xf32>
    %c0_1 = arith.constant 0 : index
    %c0_2 = arith.constant 0 : index
    %1 = vector.load %arg2[%c0_1, %c0_2] : memref<256x32xf32, #tpu.memory_space<vmem>>, vector<256x32xf32>
    %cst = arith.constant dense<0.000000e+00> : vector<8x32xf32>
    %2 = tpu.matmul %0, %1, %cst {dimension_numbers = #tpu.dot_dimension_numbers<[1], [0], [0], [1], [0, 0, 1, 1], [], []>} : vector<8x256xf32>, vector<256x32xf32>, vector<8x32xf32> -> vector<8x32xf32>
    %c0_3 = arith.constant 0 : index
    %c0_4 = arith.constant 0 : index
    %3 = vector.load %arg3[%c0_3, %c0_4] : memref<1x32xf32, #tpu.memory_space<vmem>>, vector<1x32xf32>
    %4 = vector.broadcast %3 : vector<1x32xf32> to vector<8x32xf32>
    %5 = arith.addf %2, %4 : vector<8x32xf32>
    %cst_5 = arith.constant 0.000000e+00 : f32
    %6 = vector.broadcast %cst_5 : f32 to vector<8x32xf32>
    %7 = arith.maximumf %5, %6 : vector<8x32xf32>
    %c0_6 = arith.constant 0 : index
    %c0_7 = arith.constant 0 : index
    %8 = vector.load %arg4[%c0_6, %c0_7] : memref<32x128xf32, #tpu.memory_space<vmem>>, vector<32x128xf32>
    %cst_8 = arith.constant dense<0.000000e+00> : vector<8x128xf32>
    %9 = tpu.matmul %7, %8, %cst_8 {dimension_numbers = #tpu.dot_dimension_numbers<[1], [0], [0], [1], [0, 0, 1, 1], [], []>} : vector<8x32xf32>, vector<32x128xf32>, vector<8x128xf32> -> vector<8x128xf32>
    %c0_9 = arith.constant 0 : index
    %c0_10 = arith.constant 0 : index
    %10 = vector.load %arg5[%c0_9, %c0_10] : memref<1x128xf32, #tpu.memory_space<vmem>>, vector<1x128xf32>
    %11 = vector.broadcast %10 : vector<1x128xf32> to vector<8x128xf32>
    %12 = arith.addf %9, %11 : vector<8x128xf32>
    %c0_11 = arith.constant 0 : index
    %c0_12 = arith.constant 0 : index
    %13 = vector.load %arg6[%c0_11, %c0_12] : memref<8x128xf32, #tpu.memory_space<vmem>>, vector<8x128xf32>
    tpu.vector_store %arg6[%c0_11, %c0_12], %12 {strides = array<i32>} : memref<8x128xf32, #tpu.memory_space<vmem>>, vector<8x128xf32>,
    return
  }
  func.func @transform_0(%arg0: i32) -> (i32, i32) {
    %c0_i32 = arith.constant 0 : i32
    %c0_i32_0 = arith.constant 0 : i32
    return %arg0, %c0_i32 : i32, i32
  }
  func.func @transform_1(%arg0: i32) -> (i32, i32) {
    %c0_i32 = arith.constant 0 : i32
    %c0_i32_0 = arith.constant 0 : i32
    %c0_i32_1 = arith.constant 0 : i32
    return %c0_i32, %c0_i32_0 : i32, i32
  }
  func.func @transform_2(%arg0: i32) -> (i32, i32) {
    %c0_i32 = arith.constant 0 : i32
    %c0_i32_0 = arith.constant 0 : i32
    %c0_i32_1 = arith.constant 0 : i32
    return %c0_i32, %c0_i32_0 : i32, i32
  }
  func.func @transform_3(%arg0: i32) -> (i32, i32) {
    %c0_i32 = arith.constant 0 : i32
    %c0_i32_0 = arith.constant 0 : i32
    %c0_i32_1 = arith.constant 0 : i32
    return %c0_i32, %c0_i32_0 : i32, i32
  }
  func.func @transform_4(%arg0: i32) -> (i32, i32) {
    %c0_i32 = arith.constant 0 : i32
    %c0_i32_0 = arith.constant 0 : i32
    %c0_i32_1 = arith.constant 0 : i32
    return %c0_i32, %c0_i32_0 : i32, i32
  }
  func.func @transform_5(%arg0: i32) -> (i32, i32) {
    %c0_i32 = arith.constant 0 : i32
    %c0_i32_0 = arith.constant 0 : i32
    return %arg0, %c0_i32 : i32, i32
  }
}

module attributes {stable_mosaic.version = 11 : i64} {
  func.func @upsample_kernel(%arg0: i32, %arg1: i32, %arg2: memref<16x2xf32, #tpu.memory_space<vmem>>, %arg3: memref<16x2xf32, #tpu.memory_space<vmem>>, %arg4: memref<2x16xf32, #tpu.memory_space<vmem>>, %arg5: memref<8x16x16xf32, #tpu.memory_space<vmem>>, %arg6: memref<16x16xf32, #tpu.memory_space<vmem>>) attributes {dimension_semantics = [#tpu.dimension_semantics<parallel>, #tpu.dimension_semantics<parallel>], iteration_bounds = array<i64: 1, 1>, scalar_prefetch = 0 : i64, scratch_operands = 1 : i64, tpu.core_type = #tpu.core_type<tc>, window_params = [{transform_indices = @transform_0, window_bounds = array<i64: 16, 2>}, {pipeline_mode = #tpu.pipeline_mode<synchronous>, transform_indices = @transform_1, window_bounds = array<i64: 16, 2>}, {transform_indices = @transform_2, window_bounds = array<i64: 2, 16>}, {transform_indices = @transform_3, window_bounds = array<i64: 8, 16, 16>}]} {
    %c0 = arith.constant 0 : index
    %c0_0 = arith.constant 0 : index
    %0 = vector.load %arg2[%c0, %c0_0] : memref<16x2xf32, #tpu.memory_space<vmem>>, vector<16x2xf32>
    %c0_1 = arith.constant 0 : index
    %c0_2 = arith.constant 0 : index
    %1 = vector.load %arg4[%c0_1, %c0_2] : memref<2x16xf32, #tpu.memory_space<vmem>>, vector<2x16xf32>
    %cst = arith.constant dense<0.000000e+00> : vector<16x16xf32>
    %2 = tpu.matmul %0, %1, %cst {dimension_numbers = #tpu.dot_dimension_numbers<[1], [0], [0], [1], [0, 0, 1, 1], [], []>} : vector<16x2xf32>, vector<2x16xf32>, vector<16x16xf32> -> vector<16x16xf32>
    %c0_3 = arith.constant 0 : index
    %c0_4 = arith.constant 0 : index
    %3 = vector.load %arg6[%c0_3, %c0_4] : memref<16x16xf32, #tpu.memory_space<vmem>>, vector<16x16xf32>
    tpu.vector_store %arg6[%c0_3, %c0_4], %2 {strides = array<i32>} : memref<16x16xf32, #tpu.memory_space<vmem>>, vector<16x16xf32>,
    %c0_5 = arith.constant 0 : index
    %c0_6 = arith.constant 0 : index
    %4 = vector.load %arg3[%c0_5, %c0_6] : memref<16x2xf32, #tpu.memory_space<vmem>>, vector<16x2xf32>
    %c0_7 = arith.constant 0 : index
    %c0_8 = arith.constant 0 : index
    %5 = vector.load %arg6[%c0_7, %c0_8] : memref<16x16xf32, #tpu.memory_space<vmem>>, vector<2x16xf32>
    %cst_9 = arith.constant dense<0.000000e+00> : vector<16x16xf32>
    %6 = tpu.matmul %4, %5, %cst_9 {dimension_numbers = #tpu.dot_dimension_numbers<[1], [0], [0], [1], [0, 0, 1, 1], [], []>} : vector<16x2xf32>, vector<2x16xf32>, vector<16x16xf32> -> vector<16x16xf32>
    %c0_10 = arith.constant 0 : index
    %c0_11 = arith.constant 0 : index
    %c0_12 = arith.constant 0 : index
    %7 = vector.load %arg5[%c0_10, %c0_11, %c0_12] : memref<8x16x16xf32, #tpu.memory_space<vmem>>, vector<1x16x16xf32>
    %8 = vector.shape_cast %7 : vector<1x16x16xf32> to vector<16x16xf32>
    %9 = vector.shape_cast %6 : vector<16x16xf32> to vector<1x16x16xf32>
    tpu.vector_store %arg5[%c0_10, %c0_11, %c0_12], %9 {strides = array<i32>} : memref<8x16x16xf32, #tpu.memory_space<vmem>>, vector<1x16x16xf32>,
    %c2 = arith.constant 2 : index
    %c0_13 = arith.constant 0 : index
    %10 = vector.load %arg6[%c2, %c0_13] : memref<16x16xf32, #tpu.memory_space<vmem>>, vector<2x16xf32>
    %cst_14 = arith.constant dense<0.000000e+00> : vector<16x16xf32>
    %11 = tpu.matmul %4, %10, %cst_14 {dimension_numbers = #tpu.dot_dimension_numbers<[1], [0], [0], [1], [0, 0, 1, 1], [], []>} : vector<16x2xf32>, vector<2x16xf32>, vector<16x16xf32> -> vector<16x16xf32>
    %c1 = arith.constant 1 : index
    %c0_15 = arith.constant 0 : index
    %c0_16 = arith.constant 0 : index
    %12 = vector.load %arg5[%c1, %c0_15, %c0_16] : memref<8x16x16xf32, #tpu.memory_space<vmem>>, vector<1x16x16xf32>
    %13 = vector.shape_cast %12 : vector<1x16x16xf32> to vector<16x16xf32>
    %14 = vector.shape_cast %11 : vector<16x16xf32> to vector<1x16x16xf32>
    tpu.vector_store %arg5[%c1, %c0_15, %c0_16], %14 {strides = array<i32>} : memref<8x16x16xf32, #tpu.memory_space<vmem>>, vector<1x16x16xf32>,
    %c4 = arith.constant 4 : index
    %c0_17 = arith.constant 0 : index
    %15 = vector.load %arg6[%c4, %c0_17] : memref<16x16xf32, #tpu.memory_space<vmem>>, vector<2x16xf32>
    %cst_18 = arith.constant dense<0.000000e+00> : vector<16x16xf32>
    %16 = tpu.matmul %4, %15, %cst_18 {dimension_numbers = #tpu.dot_dimension_numbers<[1], [0], [0], [1], [0, 0, 1, 1], [], []>} : vector<16x2xf32>, vector<2x16xf32>, vector<16x16xf32> -> vector<16x16xf32>
    %c2_19 = arith.constant 2 : index
    %c0_20 = arith.constant 0 : index
    %c0_21 = arith.constant 0 : index
    %17 = vector.load %arg5[%c2_19, %c0_20, %c0_21] : memref<8x16x16xf32, #tpu.memory_space<vmem>>, vector<1x16x16xf32>
    %18 = vector.shape_cast %17 : vector<1x16x16xf32> to vector<16x16xf32>
    %19 = vector.shape_cast %16 : vector<16x16xf32> to vector<1x16x16xf32>
    tpu.vector_store %arg5[%c2_19, %c0_20, %c0_21], %19 {strides = array<i32>} : memref<8x16x16xf32, #tpu.memory_space<vmem>>, vector<1x16x16xf32>,
    %c6 = arith.constant 6 : index
    %c0_22 = arith.constant 0 : index
    %20 = vector.load %arg6[%c6, %c0_22] : memref<16x16xf32, #tpu.memory_space<vmem>>, vector<2x16xf32>
    %cst_23 = arith.constant dense<0.000000e+00> : vector<16x16xf32>
    %21 = tpu.matmul %4, %20, %cst_23 {dimension_numbers = #tpu.dot_dimension_numbers<[1], [0], [0], [1], [0, 0, 1, 1], [], []>} : vector<16x2xf32>, vector<2x16xf32>, vector<16x16xf32> -> vector<16x16xf32>
    %c3 = arith.constant 3 : index
    %c0_24 = arith.constant 0 : index
    %c0_25 = arith.constant 0 : index
    %22 = vector.load %arg5[%c3, %c0_24, %c0_25] : memref<8x16x16xf32, #tpu.memory_space<vmem>>, vector<1x16x16xf32>
    %23 = vector.shape_cast %22 : vector<1x16x16xf32> to vector<16x16xf32>
    %24 = vector.shape_cast %21 : vector<16x16xf32> to vector<1x16x16xf32>
    tpu.vector_store %arg5[%c3, %c0_24, %c0_25], %24 {strides = array<i32>} : memref<8x16x16xf32, #tpu.memory_space<vmem>>, vector<1x16x16xf32>,
    %c8 = arith.constant 8 : index
    %c0_26 = arith.constant 0 : index
    %25 = vector.load %arg6[%c8, %c0_26] : memref<16x16xf32, #tpu.memory_space<vmem>>, vector<2x16xf32>
    %cst_27 = arith.constant dense<0.000000e+00> : vector<16x16xf32>
    %26 = tpu.matmul %4, %25, %cst_27 {dimension_numbers = #tpu.dot_dimension_numbers<[1], [0], [0], [1], [0, 0, 1, 1], [], []>} : vector<16x2xf32>, vector<2x16xf32>, vector<16x16xf32> -> vector<16x16xf32>
    %c4_28 = arith.constant 4 : index
    %c0_29 = arith.constant 0 : index
    %c0_30 = arith.constant 0 : index
    %27 = vector.load %arg5[%c4_28, %c0_29, %c0_30] : memref<8x16x16xf32, #tpu.memory_space<vmem>>, vector<1x16x16xf32>
    %28 = vector.shape_cast %27 : vector<1x16x16xf32> to vector<16x16xf32>
    %29 = vector.shape_cast %26 : vector<16x16xf32> to vector<1x16x16xf32>
    tpu.vector_store %arg5[%c4_28, %c0_29, %c0_30], %29 {strides = array<i32>} : memref<8x16x16xf32, #tpu.memory_space<vmem>>, vector<1x16x16xf32>,
    %c10 = arith.constant 10 : index
    %c0_31 = arith.constant 0 : index
    %30 = vector.load %arg6[%c10, %c0_31] : memref<16x16xf32, #tpu.memory_space<vmem>>, vector<2x16xf32>
    %cst_32 = arith.constant dense<0.000000e+00> : vector<16x16xf32>
    %31 = tpu.matmul %4, %30, %cst_32 {dimension_numbers = #tpu.dot_dimension_numbers<[1], [0], [0], [1], [0, 0, 1, 1], [], []>} : vector<16x2xf32>, vector<2x16xf32>, vector<16x16xf32> -> vector<16x16xf32>
    %c5 = arith.constant 5 : index
    %c0_33 = arith.constant 0 : index
    %c0_34 = arith.constant 0 : index
    %32 = vector.load %arg5[%c5, %c0_33, %c0_34] : memref<8x16x16xf32, #tpu.memory_space<vmem>>, vector<1x16x16xf32>
    %33 = vector.shape_cast %32 : vector<1x16x16xf32> to vector<16x16xf32>
    %34 = vector.shape_cast %31 : vector<16x16xf32> to vector<1x16x16xf32>
    tpu.vector_store %arg5[%c5, %c0_33, %c0_34], %34 {strides = array<i32>} : memref<8x16x16xf32, #tpu.memory_space<vmem>>, vector<1x16x16xf32>,
    %c12 = arith.constant 12 : index
    %c0_35 = arith.constant 0 : index
    %35 = vector.load %arg6[%c12, %c0_35] : memref<16x16xf32, #tpu.memory_space<vmem>>, vector<2x16xf32>
    %cst_36 = arith.constant dense<0.000000e+00> : vector<16x16xf32>
    %36 = tpu.matmul %4, %35, %cst_36 {dimension_numbers = #tpu.dot_dimension_numbers<[1], [0], [0], [1], [0, 0, 1, 1], [], []>} : vector<16x2xf32>, vector<2x16xf32>, vector<16x16xf32> -> vector<16x16xf32>
    %c6_37 = arith.constant 6 : index
    %c0_38 = arith.constant 0 : index
    %c0_39 = arith.constant 0 : index
    %37 = vector.load %arg5[%c6_37, %c0_38, %c0_39] : memref<8x16x16xf32, #tpu.memory_space<vmem>>, vector<1x16x16xf32>
    %38 = vector.shape_cast %37 : vector<1x16x16xf32> to vector<16x16xf32>
    %39 = vector.shape_cast %36 : vector<16x16xf32> to vector<1x16x16xf32>
    tpu.vector_store %arg5[%c6_37, %c0_38, %c0_39], %39 {strides = array<i32>} : memref<8x16x16xf32, #tpu.memory_space<vmem>>, vector<1x16x16xf32>,
    %c14 = arith.constant 14 : index
    %c0_40 = arith.constant 0 : index
    %40 = vector.load %arg6[%c14, %c0_40] : memref<16x16xf32, #tpu.memory_space<vmem>>, vector<2x16xf32>
    %cst_41 = arith.constant dense<0.000000e+00> : vector<16x16xf32>
    %41 = tpu.matmul %4, %40, %cst_41 {dimension_numbers = #tpu.dot_dimension_numbers<[1], [0], [0], [1], [0, 0, 1, 1], [], []>} : vector<16x2xf32>, vector<2x16xf32>, vector<16x16xf32> -> vector<16x16xf32>
    %c7 = arith.constant 7 : index
    %c0_42 = arith.constant 0 : index
    %c0_43 = arith.constant 0 : index
    %42 = vector.load %arg5[%c7, %c0_42, %c0_43] : memref<8x16x16xf32, #tpu.memory_space<vmem>>, vector<1x16x16xf32>
    %43 = vector.shape_cast %42 : vector<1x16x16xf32> to vector<16x16xf32>
    %44 = vector.shape_cast %41 : vector<16x16xf32> to vector<1x16x16xf32>
    tpu.vector_store %arg5[%c7, %c0_42, %c0_43], %44 {strides = array<i32>} : memref<8x16x16xf32, #tpu.memory_space<vmem>>, vector<1x16x16xf32>,
    return
  }
  func.func @transform_0(%arg0: i32, %arg1: i32) -> (i32, i32) {
    %c0_i32 = arith.constant 0 : i32
    %c0_i32_0 = arith.constant 0 : i32
    return %arg0, %c0_i32 : i32, i32
  }
  func.func @transform_1(%arg0: i32, %arg1: i32) -> (i32, i32) {
    %c0_i32 = arith.constant 0 : i32
    %c0_i32_0 = arith.constant 0 : i32
    %c0_i32_1 = arith.constant 0 : i32
    return %c0_i32, %c0_i32_0 : i32, i32
  }
  func.func @transform_2(%arg0: i32, %arg1: i32) -> (i32, i32) {
    %c0_i32 = arith.constant 0 : i32
    %c0_i32_0 = arith.constant 0 : i32
    return %c0_i32, %arg1 : i32, i32
  }
  func.func @transform_3(%arg0: i32, %arg1: i32) -> (i32, i32, i32) {
    %c0_i32 = arith.constant 0 : i32
    %c0_i32_0 = arith.constant 0 : i32
    return %arg0, %c0_i32, %arg1 : i32, i32, i32
  }
}

</mosaic_0001>

<bundles_post_ra>
// kernel: drnseg_forward.2
= control target key start
LH: loop header
LB: loop body
LE: loop exit
PB: predicated region body
PF: predicated region fallthrough
CT: control target
= control target key end

     0   :  { %v317_v53 = vmov 0.0|0.0   ;;  %vm318_vm0 = vmmov 0   ;;  %v319_v57 = vmov 0.0   ;;  %vm143_vm1 = vcmask 261120   ;;  %s473_s1 = inlined_call_operand.vmem [shape: f32[256,32], index: 1, kind: input, shape index: {}]   ;;  %s474_s0 = inlined_call_operand.vmem [shape: f32[8,256], index: 0, kind: input, shape index: {}]   ;;  %s475_s3 = inlined_call_operand.vmem [shape: f32[32,128], index: 3, kind: input, shape index: {}]   ;;  %s476_s2 = inlined_call_operand.vmem [shape: f32[1,32], index: 2, kind: input, shape index: {}]   ;;  %s477_s4 = inlined_call_operand.vmem [shape: f32[1,128], index: 4, kind: input, shape index: {}]   ;;  %s478_s5 = inlined_call_operand.vmem [shape: f32[8,128], index: 5, kind: output, shape index: {}]  }
   0x1   :  { %v38_v0 = vld [vmem:[%s473_s1 + $0x80] sm:$0xff]  ;;  %v39_v1 = vld [vmem:[%s473_s1 + $0x88] sm:$0xff]  ;;  %v40_v5 = vld [vmem:[%s473_s1 + $0x90] sm:$0xff]  ;;  %308 = vmatprep.subr.bf16.mxu1 %v317_v53  ;;  %273 = vmatprep.mubr.msk.f32.mxu1 %vm318_vm0, %v319_v57 }
   0x2   :  { %v22_v2 = vld [vmem:[%s473_s1] sm:$0xff]  ;;  %v276_v3 = vpack.c.bf16 %v39_v1, %v38_v0  ;;  %v23_v4 = vld [vmem:[%s473_s1 + $0x8] sm:$0xff]  ;;  %v41_v6 = vld [vmem:[%s473_s1 + $0x98] sm:$0xff] }
   0x3   :  { %v278_v7 = vpack.c.bf16 %v23_v4, %v22_v2  ;;  %v280_v8 = vpack.c.bf16 %v41_v6, %v40_v5  ;;  %v24_v9 = vld [vmem:[%s473_s1 + $0x10] sm:$0xff]  ;;  %v25_v10 = vld [vmem:[%s473_s1 + $0x18] sm:$0xff]  ;;  %v42_v11 = vld [vmem:[%s473_s1 + $0xa0] sm:$0xff] }
   0x4   :  { %277 = vmatprep.subr.bf16.mxu0 %v276_v3  ;;  %v43_v12 = vld [vmem:[%s473_s1 + $0xa8] sm:$0xff]  ;;  %v282_v13 = vpack.c.bf16 %v25_v10, %v24_v9  ;;  %v26_v15 = vld [vmem:[%s473_s1 + $0x20] sm:$0xff]  ;;  %v44_v17 = vld [vmem:[%s473_s1 + $0xb0] sm:$0xff] }
   0x5   :  { %279 = vmatpush3.bf16.msra.mxu0 %v278_v7  ;;  %v284_v14 = vpack.c.bf16 %v43_v12, %v42_v11  ;;  %v27_v16 = vld [vmem:[%s473_s1 + $0x28] sm:$0xff]  ;;  %v45_v18 = vld [vmem:[%s473_s1 + $0xb8] sm:$0xff]  ;;  %v28_v21 = vld [vmem:[%s473_s1 + $0x30] sm:$0xff] }
   0x6   :  { %281 = vmatprep.subr.bf16.mxu0 %v280_v8  ;;  %v286_v19 = vpack.c.bf16 %v27_v16, %v26_v15  ;;  %v288_v20 = vpack.c.bf16 %v45_v18, %v44_v17  ;;  %v29_v22 = vld [vmem:[%s473_s1 + $0x38] sm:$0xff]  ;;  %v46_v23 = vld [vmem:[%s473_s1 + $0xc0] sm:$0xff]  ;;  %v47_v24 = vld [vmem:[%s473_s1 + $0xc8] sm:$0xff] }
   0x7   :  { %v21_v25 = vld [vmem:[%s474_s0 + $0x8] sm:$0xff]  ;;  %v290_v26 = vpack.c.bf16 %v29_v22, %v28_v21  ;;  %v292_v27 = vpack.c.bf16 %v47_v24, %v46_v23  ;;  %v30_v28 = vld [vmem:[%s473_s1 + $0x40] sm:$0xff]  ;;  %v48_v30 = vld [vmem:[%s473_s1 + $0xd0] sm:$0xff] }
   0x8   :  { %125 = vmatprep.mubr.f32.mxu0 %v21_v25  ;;  %v31_v29 = vld [vmem:[%s473_s1 + $0x48] sm:$0xff]  ;;  %v49_v31 = vld [vmem:[%s473_s1 + $0xd8] sm:$0xff]  ;;  %v32_v34 = vld [vmem:[%s473_s1 + $0x50] sm:$0xff] }
   0x9   :  { %283 = vmatpush3.bf16.msra.mxu0 %v282_v13  ;;  %v294_v32 = vpack.c.bf16 %v31_v29, %v30_v28  ;;  %v296_v33 = vpack.c.bf16 %v49_v31, %v48_v30  ;;  %v33_v35 = vld [vmem:[%s473_s1 + $0x58] sm:$0xff]  ;;  %v50_v36 = vld [vmem:[%s473_s1 + $0xe0] sm:$0xff]  ;;  %v51_v37 = vld [vmem:[%s473_s1 + $0xe8] sm:$0xff] }
   0xa   :  { %285 = vmatprep.subr.bf16.mxu0 %v284_v14  ;;  %v298_v38 = vpack.c.bf16 %v33_v35, %v32_v34  ;;  %v300_v39 = vpack.c.bf16 %v51_v37, %v50_v36  ;;  %v34_v40 = vld [vmem:[%s473_s1 + $0x60] sm:$0xff]  ;;  %v35_v41 = vld [vmem:[%s473_s1 + $0x68] sm:$0xff]  ;;  %v52_v42 = vld [vmem:[%s473_s1 + $0xf0] sm:$0xff] }
   0xb   :  { %v53_v43 = vld [vmem:[%s473_s1 + $0xf8] sm:$0xff]  ;;  %v302_v44 = vpack.c.bf16 %v35_v41, %v34_v40  ;;  %v36_v46 = vld [vmem:[%s473_s1 + $0x70] sm:$0xff]  ;;  %v20_v49 = vld [vmem:[%s474_s0] sm:$0xff] }
   0xc   :  { %v304_v45 = vpack.c.bf16 %v53_v43, %v52_v42  ;;  %v37_v47 = vld [vmem:[%s473_s1 + $0x78] sm:$0xff]  ;;  %v132_v50 = vld [vmem:[%s475_s3] sm:$0xff]  ;;  %v133_v51 = vld [vmem:[%s475_s3 + $0x8] sm:$0xff] }
   0xd   :  { %287 = vmatpush3.bf16.msra.mxu0 %v286_v19  ;;  %v306_v48 = vpack.c.bf16 %v37_v47, %v36_v46  ;;  %v309_v52 = vpack.c.bf16 %v133_v51, %v132_v50  ;;  %v134_v54 = vld [vmem:[%s475_s3 + $0x10] sm:$0xff]  ;;  %v135_v55 = vld [vmem:[%s475_s3 + $0x18] sm:$0xff]  ;;  %v222_v59 = vld [vmem:[%s476_s2] ss:$0 sm:$0xff] }
   0xe   :  { %289 = vmatprep.subr.bf16.mxu0 %v288_v20  ;;  %v312_v56 = vpack.c.bf16 %v135_v55, %v134_v54  ;;  %v223_v0 = vld [vmem:[%s477_s4] ss:$0 sm:$0xff] }
   0xf   :  { %310 = vmatpush3.bf16.msra.mxu1 %v309_v52 }
  0x10   :  { %311 = vmatprep.subr.bf16.mxu1 %v317_v53 }
  0x11   :  { %291 = vmatpush3.bf16.msra.mxu0 %v290_v26 }
  0x12   :  { %293 = vmatprep.subr.bf16.mxu0 %v292_v27 }
  0x13   :  { %313 = vmatpush3.bf16.msra.mxu1 %v312_v56 }
  0x15   :  { %295 = vmatpush3.bf16.msra.mxu0 %v294_v32 }
  0x16   :  { %297 = vmatprep.subr.bf16.mxu0 %v296_v33 }
  0x19   :  { %299 = vmatpush3.bf16.msra.mxu0 %v298_v38 }
  0x1a   :  { %301 = vmatprep.subr.bf16.mxu0 %v300_v39 }
  0x1d   :  { %303 = vmatpush3.bf16.msra.mxu0 %v302_v44 }
  0x1e   :  { %305 = vmatprep.subr.bf16.mxu0 %v304_v45 }
  0x21   :  { %307 = vmatpush3.bf16.msra.mxu0 %v306_v48 }
  0x24   :  { %126 = vmatmul.mubr.f32.vlgmr.msra.gmra.mrb[0].mxu0 %v20_v49 }
  0xf7   :  { %v257_v58 = vpop.f32.mrb[0].mxu0 }
  0xf8   :  { %v258_v60 = vpop.f32.mrb[1].mxu0 }
  0xf9   :  { %v259_v61 = vadd.f32 %v258_v60, %v257_v58 }
  0xfb   :  { %v128_v62 = vadd.f32 %v259_v61, %v222_v59 }
  0xfd   :  { %v131_v63 = vmax.f32 %v128_v62, 0.0 }
  0xff   :  { %274 = vmatmul.mubr.msk.f32.vlgmr.msra.gmra.mrb[0].mxu1 %vm143_vm1, %v131_v63 }
 0x1d2   :  { %v213_v1 = vpop.f32.mrb[0].mxu1 }
 0x1d3   :  { %v214_v2 = vadd.f32 %v223_v0, %v213_v1  ;;  %v275_v3 = vpop.f32.mrb[1].mxu1 }
 0x1d5   :  { %217 = vst [vmem:[%s478_s5] sm:$0xff] %v214_v2 }

// kernel: drnseg_forward.3
= control target key start
LH: loop header
LB: loop body
LE: loop exit
PB: predicated region body
PF: predicated region fallthrough
CT: control target
= control target key end

     0   :  { %vm25_vm0 = vcmask 1041408   ;;  %vm18_vm1 = vcmask 15360   ;;  %s1016_s0 = inlined_call_operand.vmem [shape: f32[16,2], index: 0, kind: input, shape index: {}]   ;;  %s1017_s1 = inlined_call_operand.vmem [shape: f32[16,2], index: 1, kind: input, shape index: {}]   ;;  %s1018_s2 = inlined_call_operand.vmem [shape: f32[2,16], index: 2, kind: input, shape index: {}]   ;;  %s1019_s3 = inlined_call_operand.hbm [shape: f32[8,16,16], index: 3, kind: output, shape index: {}]  }
   0x1   :  { %v17_v0 = vld [vmem:[%s1018_s2] sm:$0x3]  ;;  %v16_v2 = vld [vmem:[%s1016_s0 + $0x8] sm:$0xff] }
   0x2   :  { %v15_v1 = vld [vmem:[%s1016_s0] sm:$0xff]  ;;  %840 = vmatprep.subr.msk.mxu0 %vm25_vm0, %v17_v0 }
   0x3   :  { %842 = vmatprep.mubr.msk.f32.mxu0 %vm18_vm1, %v15_v1 }
   0x4   :  { %8 = vsyncpa [#allocation4], 0  ;;  %841 = vmatpush3.msk.msra.mxu0 %vm25_vm0, %v17_v0  ;;  %v107_v3 = vld [vmem:[%s1017_s1] sm:$0xff]  ;;  %vm104_vm2 = vcmask 130048   ;;  %v108_v8 = vld [vmem:[%s1017_s1 + $0x8] sm:$0xff]  ;;  %s912_s1 = smov [#allocation3]  }
   0x5   :  { %843 = vmatmul.mubr.msk.f32.vlgmr.msra.gmra.mrb[0].mxu0 %vm18_vm1, %v16_v2  ;;  %847 = vmatprep.mubr.msk.f32.mxu1 %vm18_vm1, %v107_v3  ;;  %s775_s20 = sshll.u32 %s912_s1, 4  ;;  %s776_s20 = int_to_ptr.vmem [resolvable:$true] %s775_s20 }
   0x6   :  { %852 = vmatprep.mubr.msk.f32.mxu0 %vm18_vm1, %v107_v3  ;;  %s888_s21 = scalar_lea.vmem %s776_s20, 2048  ;;  %p893_p1 = scmp.lt.s32.totalorder %s776_s20, %s776_s20 }
   0x7   :  { %p889_p0 = scmp.ne.s32.totalorder %s776_s20, %s888_s21  ;;  %p894_p2 = scmp.lt.s32.totalorder %s888_s21, %s888_s21 }
   0x9   :  { %p895_p3 = por %p894_p2, %p893_p1 }
   0xb   :  { %p896_p4 = pnand %p895_p3, %p889_p0 }
  0xd8   :  { %v844_v4 = vpop.f32.mrb[0].mxu0 }
  0xd9   :  { %106 = vst.msk [vmem:[#allocation2 + $0x8] sm:$0xff] %vm104_vm2, %v844_v4  ;;  %v95_v5 = vpop.f32.mrb[1].mxu0 }
  0xda   :  { %105 = vst.msk [vmem:[#allocation2] sm:$0xff] %vm104_vm2, %v95_v5 }
  0xe0   :  { %v442_v11 = vld [vmem:[#allocation2 + $0x8] sm:$0x3]  ;;  %v524_v12 = vld [vmem:[#allocation2 + $0xa] sm:$0x3]  ;;  %v606_v13 = vld [vmem:[#allocation2 + $0xc] sm:$0x3] }
  0xe1   :  { %v109_v6 = vld [vmem:[#allocation2] sm:$0x3]  ;;  %v196_v7 = vld [vmem:[#allocation2 + $0x2] sm:$0x3]  ;;  %v278_v9 = vld [vmem:[#allocation2 + $0x4] sm:$0x3] }
  0xe2   :  { %845 = vmatprep.subr.msk.mxu1 %vm25_vm0, %v109_v6  ;;  %850 = vmatprep.subr.msk.mxu0 %vm25_vm0, %v196_v7  ;;  %v360_v10 = vld [vmem:[#allocation2 + $0x6] sm:$0x3]  ;;  %v688_v14 = vld [vmem:[#allocation2 + $0xe] sm:$0x3] }
  0xe3   :  { %846 = vmatpush3.msk.msra.mxu1 %vm25_vm0, %v109_v6  ;;  %851 = vmatpush3.msk.msra.mxu0 %vm25_vm0, %v196_v7 }
  0xe4   :  { %848 = vmatmul.mubr.msk.f32.vlgmr.msra.gmra.mrb[0].mxu1 %vm18_vm1, %v108_v8  ;;  %853 = vmatmul.mubr.msk.f32.vlgmr.msra.gmra.mrb[2].mxu0 %vm18_vm1, %v108_v8 }
  0xe5   :  { %855 = vmatprep.subr.msk.mxu1 %vm25_vm0, %v278_v9  ;;  %860 = vmatprep.subr.msk.mxu0 %vm25_vm0, %v360_v10 }
  0xe6   :  { %856 = vmatpush3.msk.msra.mxu1 %vm25_vm0, %v278_v9  ;;  %861 = vmatpush3.msk.msra.mxu0 %vm25_vm0, %v360_v10 }
  0xe7   :  { %865 = vmatprep.subr.msk.mxu1 %vm25_vm0, %v442_v11  ;;  %870 = vmatprep.subr.msk.mxu0 %vm25_vm0, %v524_v12 }
  0xe8   :  { %857 = vmatprep.mubr.msk.f32.mxu1 %vm18_vm1, %v107_v3  ;;  %862 = vmatprep.mubr.msk.f32.mxu0 %vm18_vm1, %v107_v3 }
  0xe9   :  { %858 = vmatmul.mubr.msk.f32.vlgmr.msra.gmra.mrb[2].mxu1 %vm18_vm1, %v108_v8  ;;  %863 = vmatmul.mubr.msk.f32.vlgmr.msra.gmra.mrb[4].mxu0 %vm18_vm1, %v108_v8 }
  0xea   :  { %866 = vmatpush3.msk.msra.mxu1 %vm25_vm0, %v442_v11  ;;  %871 = vmatpush3.msk.msra.mxu0 %vm25_vm0, %v524_v12 }
  0xeb   :  { %875 = vmatprep.subr.msk.mxu1 %vm25_vm0, %v606_v13  ;;  %880 = vmatprep.subr.msk.mxu0 %vm25_vm0, %v688_v14 }
  0xec   :  { %867 = vmatprep.mubr.msk.f32.mxu1 %vm18_vm1, %v107_v3  ;;  %872 = vmatprep.mubr.msk.f32.mxu0 %vm18_vm1, %v107_v3 }
  0xed   :  { %868 = vmatmul.mubr.msk.f32.vlgmr.msra.gmra.mrb[4].mxu1 %vm18_vm1, %v108_v8  ;;  %873 = vmatmul.mubr.msk.f32.vlgmr.msra.gmra.mrb[6].mxu0 %vm18_vm1, %v108_v8 }
  0xee   :  { %876 = vmatpush3.msk.msra.mxu1 %vm25_vm0, %v606_v13  ;;  %881 = vmatpush3.msk.msra.mxu0 %vm25_vm0, %v688_v14 }
  0xef   :  { %877 = vmatprep.mubr.msk.f32.mxu1 %vm18_vm1, %v107_v3  ;;  %882 = vmatprep.mubr.msk.f32.mxu0 %vm18_vm1, %v107_v3 }
  0xf1   :  { %878 = vmatmul.mubr.msk.f32.vlgmr.msra.gmra.mrb[6].mxu1 %vm18_vm1, %v108_v8  ;;  %883 = vmatmul.mubr.msk.f32.vlgmr.msra.gmra.mrb[8].mxu0 %vm18_vm1, %v108_v8 }
 0x1b7   :  { %v849_v15 = vpop.f32.mrb[0].mxu1  ;;  %v854_v16 = vpop.f32.mrb[2].mxu0 }
 0x1b8   :  { %195 = vst.msk [vmem:[#allocation3 + $0x8] sm:$0xff] %vm104_vm2, %v849_v15  ;;  %277 = vst.msk [vmem:[#allocation3 + $0x18] sm:$0xff] %vm104_vm2, %v854_v16  ;;  %v185_v17 = vpop.f32.mrb[1].mxu1  ;;  %v266_v18 = vpop.f32.mrb[3].mxu0 }
 0x1b9   :  { %194 = vst.msk [vmem:[#allocation3] sm:$0xff] %vm104_vm2, %v185_v17  ;;  %276 = vst.msk [vmem:[#allocation3 + $0x10] sm:$0xff] %vm104_vm2, %v266_v18 }
 0x1bc   :  { %v859_v19 = vpop.f32.mrb[2].mxu1  ;;  %v864_v20 = vpop.f32.mrb[4].mxu0 }
 0x1bd   :  { %359 = vst.msk [vmem:[#allocation3 + $0x28] sm:$0xff] %vm104_vm2, %v859_v19  ;;  %441 = vst.msk [vmem:[#allocation3 + $0x38] sm:$0xff] %vm104_vm2, %v864_v20  ;;  %v348_v21 = vpop.f32.mrb[3].mxu1  ;;  %v430_v22 = vpop.f32.mrb[5].mxu0 }
 0x1be   :  { %358 = vst.msk [vmem:[#allocation3 + $0x20] sm:$0xff] %vm104_vm2, %v348_v21  ;;  %440 = vst.msk [vmem:[#allocation3 + $0x30] sm:$0xff] %vm104_vm2, %v430_v22 }
 0x1c0   :  { %v869_v23 = vpop.f32.mrb[4].mxu1  ;;  %v874_v24 = vpop.f32.mrb[6].mxu0 }
 0x1c1   :  { %523 = vst.msk [vmem:[#allocation3 + $0x48] sm:$0xff] %vm104_vm2, %v869_v23  ;;  %605 = vst.msk [vmem:[#allocation3 + $0x58] sm:$0xff] %vm104_vm2, %v874_v24  ;;  %v512_v25 = vpop.f32.mrb[5].mxu1  ;;  %v594_v26 = vpop.f32.mrb[7].mxu0 }
 0x1c2   :  { %522 = vst.msk [vmem:[#allocation3 + $0x40] sm:$0xff] %vm104_vm2, %v512_v25  ;;  %604 = vst.msk [vmem:[#allocation3 + $0x50] sm:$0xff] %vm104_vm2, %v594_v26 }
 0x1c4   :  { %v879_v27 = vpop.f32.mrb[6].mxu1  ;;  %v884_v28 = vpop.f32.mrb[8].mxu0 }
 0x1c5   :  { %687 = vst.msk [vmem:[#allocation3 + $0x68] sm:$0xff] %vm104_vm2, %v879_v27  ;;  %769 = vst.msk [vmem:[#allocation3 + $0x78] sm:$0xff] %vm104_vm2, %v884_v28  ;;  %v676_v29 = vpop.f32.mrb[7].mxu1  ;;  %v758_v30 = vpop.f32.mrb[9].mxu0 }
 0x1c6   :  { %686 = vst.msk [vmem:[#allocation3 + $0x60] sm:$0xff] %vm104_vm2, %v676_v29  ;;  %768 = vst.msk [vmem:[#allocation3 + $0x70] sm:$0xff] %vm104_vm2, %v758_v30 }
 0x1c7   :  { %899 = shalt.err (!%p896_p4)
}
 0x1c8   :  { %s900_s24 = scalar_lea.hbm %s1019_s3, 2048 }
 0x1c9   :  { %p901_p5 = scmp.ne.s32.totalorder %s1019_s3, %s900_s24  ;;  %p904_p6 = scmp.lt.u32.totalorder %s900_s24, %s1019_s3 }
 0x1cb   :  { %p906_p7 = pnand %p904_p6, %p901_p5 }
 0x1cd   :  { %909 = shalt.err (!%p906_p7)
}
 0x1ce   :  { %s913_s29 = smov 128   ;;  %s914_s30 = smov 8  }
 0x1cf   :  { %781 = dma.vmem_to_hbm [thread:$0]  %s776_s20, 2048, %s1019_s3, [#allocation4], %s913_s29, %s913_s29, %s914_s30  }
 0x1d0   :  { %910 = dma.done.wait [#allocation4], 2048  }
 0x1d1   :  { %911 = vsyncadd [#allocation4], 4294965248 }
 0x1d2   :  { %785 = vsyncpa [#allocation4], 1 }

</bundles_post_ra>
